<compile_context>
chip_gen: v6e
topology: v6e:2x2x1
jax: 0.10.0
libtpu: 0.0.40
codegen_flags: <defaults>
</compile_context>

<pallas_src>
import itertools
from functools import partial

import jax
import jax.numpy as jnp
from jax import lax
from jax.experimental import pallas as pl
from jax.experimental.pallas import tpu as pltpu


# --------------------------------------------------------------------------
# helpers
# --------------------------------------------------------------------------

def _vmem_budget_bytes():
    """~75% of the physical VMEM of the attached generation (v5e/v6e: 128 MiB,
    v7x: 64 MiB).  Conservative fallback if the query is unavailable."""
    try:
        cap = int(pltpu.get_tpu_info().vmem_capacity_bytes)
    except Exception:
        cap = 64 * 2**20
    return int(cap * 3 // 4)


def _pick_batch_block(b, max_block):
    """Largest divisor of b that fits `max_block`; prefer leaving >= 2 grid
    steps (megacore), otherwise batch everything into one step."""
    max_block = max(1, min(b, int(max_block)))
    divs = [d for d in range(1, max_block + 1) if b % d == 0]
    two_step = [d for d in divs if b // d >= 2]
    if two_step and max(two_step) >= 2:
        return max(two_step)
    return max(divs)


# --------------------------------------------------------------------------
# Pallas kernel: fused (continuous + discrete) edit affinity
# --------------------------------------------------------------------------

def _aff_kernel(lhs_ref, rhs_ref, out_ref, *, offset):
    # One batched contraction per grid step (MXU), constant offset folded in.
    out_ref[...] = jnp.einsum(
        "bif,bjf->bij", lhs_ref[...], rhs_ref[...],
        preferred_element_type=jnp.float32) - offset


def mixed_edit_aff(feat1, feat2, cont_idx, dis_idx, cont_w, dis_w):
    """cont_w*(cos-1) + dis_w*(dot-1)
       = [cont_w*nrm(f1c), dis_w*f1d] @ [nrm(f2c), f2d]^T - (cont_w + dis_w)."""
    b, n1, _ = feat1.shape
    n2 = feat2.shape[1]
    lhs_parts, rhs_parts, offset = [], [], 0.0
    if cont_idx is not None:
        cf1 = feat1[..., jnp.asarray(cont_idx)]
        cf2 = feat2[..., jnp.asarray(cont_idx)]
        eps2 = 1e-24  # (F.normalize eps 1e-12) ** 2
        cf1 = cf1 * lax.rsqrt(jnp.maximum(jnp.sum(cf1 * cf1, -1, keepdims=True), eps2))
        cf2 = cf2 * lax.rsqrt(jnp.maximum(jnp.sum(cf2 * cf2, -1, keepdims=True), eps2))
        lhs_parts.append(cont_w * cf1)
        rhs_parts.append(cf2)
        offset += float(cont_w)
    if dis_idx is not None:
        lhs_parts.append(dis_w * feat1[..., jnp.asarray(dis_idx)])
        rhs_parts.append(feat2[..., jnp.asarray(dis_idx)])
        offset += float(dis_w)
    if not lhs_parts:
        return jnp.zeros((b, n1, n2), jnp.float32)
    lhs = jnp.concatenate(lhs_parts, axis=-1).astype(jnp.float32)
    rhs = jnp.concatenate(rhs_parts, axis=-1).astype(jnp.float32)
    f = lhs.shape[-1]
    bblk = _pick_batch_block(b, 16)
    kernel = partial(_aff_kernel, offset=offset)
    return pl.pallas_call(
        kernel,
        out_shape=jax.ShapeDtypeStruct((b, n1, n2), jnp.float32),
        grid=(b // bblk,),
        in_specs=[
            pl.BlockSpec((bblk, n1, f), lambda i: (i, 0, 0)),
            pl.BlockSpec((bblk, n2, f), lambda i: (i, 0, 0)),
        ],
        out_specs=pl.BlockSpec((bblk, n1, n2), lambda i: (i, 0, 0)),
        compiler_params=pltpu.CompilerParams(dimension_semantics=("parallel",)),
    )(lhs, rhs)


# --------------------------------------------------------------------------
# Pallas kernel: fused RRWM power iteration (batched, Kr resident in VMEM)
# --------------------------------------------------------------------------

def _rrwm_kernel(kt_ref, inv_ref, r_ref, ctt_ref, ct_ref, out_ref, kr_ref, *,
                 bblk, n1, n2, max_iter, sk_iter, alpha, beta):
    N = n1 * n2
    # Prologue: rescale once per block element.  kt_ref already holds K^T, so
    # the matvec below contracts the sublane axis (no runtime transpose).
    for ib in range(bblk):
        kr_ref[ib] = kt_ref[ib] * inv_ref[ib]

    r_mat = r_ref[...]    # (n2, N): R[j, k]   = 1 iff k // n1 == j
    ct_t = ctt_ref[...]   # (N, n1): Ct^T[k,i] = 1 iff k %  n1 == i
    ct_mat = ct_ref[...]  # (n1, N)

    v0 = tuple(jnp.full((1, N), 1.0 / float(N), jnp.float32) for _ in range(bblk))
    d0 = tuple(jnp.zeros((1, 1), jnp.float32) for _ in range(bblk))

    def iteration(_, carry):
        vs, dones = carry
        new_vs, new_dones = [], []
        # bblk independent chains unrolled -> ILP hides dependency latency.
        for ib in range(bblk):
            v, done = vs[ib], dones[ib]
            # random walk: Kr @ v as a lane-dense row, (1,N) @ (N,N) natural
            kv = lax.dot_general(v, kr_ref[ib], (((1,), (0,)), ((), ())),
                                 preferred_element_type=jnp.float32)       # (1, N)
            last_v = kv
            l1 = jnp.sum(jnp.abs(kv), axis=1, keepdims=True)
            vn = kv * pl.reciprocal(l1, approx=True)
            # reweighted jump: Vmat = S^T, shape (n2, n1)
            vmat = lax.dot_general(r_mat * vn, ct_t, (((1,), (0,)), ((), ())),
                                   preferred_element_type=jnp.float32)     # (n2, n1)
            smax = jnp.max(jnp.max(vmat, axis=1, keepdims=True),
                           axis=0, keepdims=True)
            logs = beta * vmat / smax

            def sk_pair(_, ls):
                # normalize over the n2 axis of S (= axis 0 of Vmat), then n1
                m0 = jnp.max(ls, axis=0, keepdims=True)
                ls = ls - (m0 + jnp.log(jnp.sum(jnp.exp(ls - m0), axis=0, keepdims=True)))
                m1 = jnp.max(ls, axis=1, keepdims=True)
                ls = ls - (m1 + jnp.log(jnp.sum(jnp.exp(ls - m1), axis=1, keepdims=True)))
                return ls

            logs = lax.fori_loop(0, sk_iter // 2, sk_pair, logs)
            if sk_iter % 2 == 1:
                m0 = jnp.max(logs, axis=0, keepdims=True)
                logs = logs - (m0 + jnp.log(jnp.sum(jnp.exp(logs - m0),
                                                    axis=0, keepdims=True)))
            sk_t = jnp.exp(logs)                                           # (n2, n1)
            # back to the flat column-major vec, lane-dense (1, N)
            sk_flat = jnp.sum(
                r_mat * lax.dot_general(sk_t, ct_mat, (((1,), (0,)), ((), ())),
                                        preferred_element_type=jnp.float32),
                axis=0, keepdims=True)
            vn = alpha * sk_flat + (1.0 - alpha) * vn
            l1 = jnp.sum(jnp.abs(vn), axis=1, keepdims=True)
            vn = vn * pl.reciprocal(l1, approx=True)
            # per-element convergence freeze (reference uses a global batch
            # norm; once converged the update is < 1e-5 so results match).
            sq = jnp.sum((vn - last_v) ** 2, axis=1, keepdims=True)
            nd = jnp.maximum(done, (sq < 1e-10).astype(jnp.float32))
            new_vs.append(done * v + (1.0 - done) * vn)
            new_dones.append(nd)
        return tuple(new_vs), tuple(new_dones)

    # TODO(synk): early exit for fully converged blocks (lax.while_loop on the
    # done flags) skipped to avoid a vector->scalar predicate lowering risk.
    vs, _ = lax.fori_loop(0, max_iter, iteration, (v0, d0))
    for ib in range(bblk):
        out_ref[ib] = vs[ib]          # lane-dense (1, N) row per element


def rrwm(K_t, n1, n2, max_iter=50, sk_iter=20, alpha=0.2, beta=30.0):
    """Reweighted random-walk matching (pygm.rrwm defaults) on the TRANSPOSED
    affinity matrix, fused in one pallas_call per batch block with Kr resident
    in VMEM for all iterations."""
    b, N, _ = K_t.shape
    # rescale denominators: row sums of K == column sums of K^T
    d = jnp.sum(K_t, axis=1, keepdims=True)              # (b, 1, N)
    dmax = jnp.max(d, axis=2, keepdims=True)              # (b, 1, 1)
    dmin = jnp.min(d)
    inv_denom = 1.0 / (dmax + dmin * 1e-5)                 # reciprocal-multiply in-kernel

    # constant selector matrices for flat <-> (n2, n1) conversions in-kernel
    k_idx = jnp.arange(N)
    r_mat = (k_idx[None, :] // n1 == jnp.arange(n2)[:, None]).astype(jnp.float32)  # (n2, N)
    ct_mat = (k_idx[None, :] % n1 == jnp.arange(n1)[:, None]).astype(jnp.float32)  # (n1, N)
    ct_t = ct_mat.T                                                                 # (N, n1)

    # generation-aware VMEM budgeting: K block (double-buffered) + Kr scratch
    budget = _vmem_budget_bytes()
    per_elem = 3 * N * N * 4 + 8 * N * 4
    fixed = 2 * (n2 * N + n1 * N + N * n1) * 4 + (1 << 20)
    max_bblk = max(1, (budget - fixed) // per_elem)
    bblk = _pick_batch_block(b, min(max_bblk, 8))
    vmem_limit = int(min(budget, max(16 * 2**20, fixed + bblk * per_elem + (2 << 20))))
    # TODO(synk): pl.Buffered(1) on the K input would free one (bblk,N,N)
    # buffer on v7x; left at the default depth to keep the lowering proven.
    # TODO(synk): for very large N tile K along the contraction axis instead of
    # holding a full (N, N) block resident.

    kernel = partial(_rrwm_kernel, bblk=bblk, n1=n1, n2=n2, max_iter=max_iter,
                     sk_iter=sk_iter, alpha=float(alpha), beta=float(beta))
    vflat = pl.pallas_call(
        kernel,
        out_shape=jax.ShapeDtypeStruct((b, 1, N), jnp.float32),
        grid=(b // bblk,),
        in_specs=[
            pl.BlockSpec((bblk, N, N), lambda i: (i, 0, 0)),
            pl.BlockSpec((bblk, 1, 1), lambda i: (i, 0, 0)),
            pl.BlockSpec((n2, N), lambda i: (0, 0)),
            pl.BlockSpec((N, n1), lambda i: (0, 0)),
            pl.BlockSpec((n1, N), lambda i: (0, 0)),
        ],
        out_specs=pl.BlockSpec((bblk, 1, N), lambda i: (i, 0, 0)),
        scratch_shapes=[pltpu.VMEM((bblk, N, N), jnp.float32)],
        compiler_params=pltpu.CompilerParams(
            dimension_semantics=("parallel",),
            vmem_limit_bytes=vmem_limit),
    )(K_t, inv_denom, r_mat, ct_t, ct_mat)
    # v[k] with k = j*n1 + i equals S[i, j]; cheap wrapper-side layout fixup.
    return jnp.transpose(vflat.reshape(b, n2, n1), (0, 2, 1))


# --------------------------------------------------------------------------
# quadratic affinity score  vec(X^T)^T K vec(X^T)   (gather-based, in JAX)
# --------------------------------------------------------------------------

def affinity_score(X, K_t, n1):
    """X is a 0/1 (partial) permutation matrix, so the score is the sum of the
    n1 x n1 submatrix of K at the matched flat indices.  That submatrix sum is
    transpose-invariant, so K^T is used directly.  Gathering n1^2 entries
    avoids re-streaming the full (N, N) K per batch element."""
    b = X.shape[0]
    cols = jnp.argmax(X, axis=2)                            # (b, n1)
    hit = jnp.max(X, axis=2)                                 # (b, n1)
    flat = cols * n1 + jnp.arange(n1)[None, :]               # vec index j*n1 + i
    bidx = jnp.arange(b)[:, None, None]
    sub = K_t[bidx, flat[:, :, None], flat[:, None, :]]      # (b, n1, n1)
    w = hit[:, :, None] * hit[:, None, :]
    return jnp.sum(sub * w, axis=(1, 2))


# --------------------------------------------------------------------------
# Graph-matching glue (plain JAX)
# --------------------------------------------------------------------------

def build_aff_mat_t(node_aff, edge_aff, conn1, conn2, n1, n2):
    """TRANSPOSED Lawler QAP affinity matrix K^T (pygmtools column-major vec
    convention).  Building K^T directly at scatter time lets the RRWM kernel
    contract the natural (sublane) axis for Kr @ v without any transpose."""
    b = node_aff.shape[0]
    N = n1 * n2
    Kt = jnp.zeros((b, N, N), dtype=jnp.float32)
    start1, end1 = conn1[:, :, 0], conn1[:, :, 1]   # (b, ne1)
    start2, end2 = conn2[:, :, 0], conn2[:, :, 1]   # (b, ne2)
    row = start2[:, None, :] * n1 + start1[:, :, None]   # (b, ne1, ne2)
    col = end2[:, None, :] * n1 + end1[:, :, None]
    batch_idx = jnp.arange(b)[:, None, None]
    # K[row, col] = edge_aff  =>  K^T[col, row] = edge_aff
    # TODO(synk): duplicate/parallel edges keep an arbitrary value under .set();
    # verify against the intended pygmtools scatter semantics if that can occur.
    # TODO(synk): fusing this scatter into the RRWM kernel (scalar-prefetched
    # connectivity) would remove K's HBM round trip entirely.
    Kt = Kt.at[batch_idx, col, row].set(edge_aff)
    diag = jnp.transpose(node_aff, (0, 2, 1)).reshape(b, N)   # index j2*n1 + i1
    didx = jnp.arange(N)
    Kt = Kt.at[:, didx, didx].set(diag)
    return Kt


def hungarian(match_mat):
    """Optimal square assignment by exhaustive permutation search."""
    b, n1, n2 = match_mat.shape
    assert n1 == n2  # TODO(synk): rectangular / partial Hungarian assignment not implemented
    perms = jnp.asarray(list(itertools.permutations(range(n2))), dtype=jnp.int32)
    rows = jnp.arange(n1, dtype=jnp.int32)
    scores = jnp.sum(match_mat[:, rows[None, :], perms], axis=-1)  # (b, P)
    best = jnp.argmax(scores, axis=1)
    best_perm = perms[best]  # (b, n1)
    return jax.nn.one_hot(best_perm, n2, dtype=match_mat.dtype)


# --------------------------------------------------------------------------
# Module
# --------------------------------------------------------------------------

class GEDasMatchLoss:
    def __init__(self, node_size, cont_node_indices, dis_node_indices,
                 cont_edge_indices, dis_edge_indices,
                 cont_edit_weight=0.25, dis_edit_weight=0.5):
        self.max_gen_nodes = node_size
        self.cont_node_indices = cont_node_indices
        self.dis_node_indices = dis_node_indices
        self.cont_edge_indices = cont_edge_indices
        self.dis_edge_indices = dis_edge_indices
        self.cont_edit_weight = cont_edit_weight
        self.dis_edit_weight = dis_edit_weight

    def __call__(self, gen_X, gen_A, gen_E, obs_X, obs_A, obs_E):
        b, n1, _ = gen_X.shape
        n2 = obs_X.shape[1]

        node_aff = mixed_edit_aff(gen_X, obs_X, self.cont_node_indices,
                                  self.dis_node_indices,
                                  self.cont_edit_weight, self.dis_edit_weight)
        edge_aff = mixed_edit_aff(gen_E, obs_E, self.cont_edge_indices,
                                  self.dis_edge_indices,
                                  self.cont_edit_weight, self.dis_edit_weight)

        conn1 = jnp.transpose(gen_A, (0, 2, 1))  # (b, ne1, 2)
        conn2 = jnp.transpose(obs_A, (0, 2, 1))  # (b, ne2, 2)
        aff_mat_t = build_aff_mat_t(node_aff, edge_aff, conn1, conn2, n1, n2)

        match_mat = rrwm(aff_mat_t, n1, n2)
        dis_match_mat = hungarian(match_mat)

        score = affinity_score(dis_match_mat, aff_mat_t, n1)  # (b,)
        return -1.0 * score


# --------------------------------------------------------------------------
# Demo
# --------------------------------------------------------------------------

if __name__ == "__main__":
    B, N1, N2 = 2, 4, 4
    NE1, NE2 = 6, 6
    F_NODE_CONT, F_NODE_DIS = 3, 3   # node feature dim = 6
    F_EDGE_CONT, F_EDGE_DIS = 2, 2   # edge feature dim = 4

    key = jax.random.PRNGKey(0)
    ks = jax.random.split(key, 10)

    gen_Xc = jax.random.normal(ks[0], (B, N1, F_NODE_CONT), jnp.float32)
    gen_Xd = jax.nn.one_hot(jax.random.randint(ks[1], (B, N1), 0, F_NODE_DIS),
                            F_NODE_DIS, dtype=jnp.float32)
    gen_X = jnp.concatenate([gen_Xc, gen_Xd], axis=-1)

    obs_Xc = jax.random.normal(ks[2], (B, N2, F_NODE_CONT), jnp.float32)
    obs_Xd = jax.nn.one_hot(jax.random.randint(ks[3], (B, N2), 0, F_NODE_DIS),
                            F_NODE_DIS, dtype=jnp.float32)
    obs_X = jnp.concatenate([obs_Xc, obs_Xd], axis=-1)

    gen_Ec = jax.random.normal(ks[4], (B, NE1, F_EDGE_CONT), jnp.float32)
    gen_Ed = jax.nn.one_hot(jax.random.randint(ks[5], (B, NE1), 0, F_EDGE_DIS),
                            F_EDGE_DIS, dtype=jnp.float32)
    gen_E = jnp.concatenate([gen_Ec, gen_Ed], axis=-1)

    obs_Ec = jax.random.normal(ks[6], (B, NE2, F_EDGE_CONT), jnp.float32)
    obs_Ed = jax.nn.one_hot(jax.random.randint(ks[7], (B, NE2), 0, F_EDGE_DIS),
                            F_EDGE_DIS, dtype=jnp.float32)
    obs_E = jnp.concatenate([obs_Ec, obs_Ed], axis=-1)

    gen_A = jax.random.randint(ks[8], (B, 2, NE1), 0, N1).astype(jnp.int32)
    obs_A = jax.random.randint(ks[9], (B, 2, NE2), 0, N2).astype(jnp.int32)

    loss = GEDasMatchLoss(
        node_size=N1,
        cont_node_indices=(0, 1, 2), dis_node_indices=(3, 4, 5),
        cont_edge_indices=(0, 1), dis_edge_indices=(2, 3),
        cont_edit_weight=0.25, dis_edit_weight=0.5)

    out = jax.jit(loss)(gen_X, gen_A, gen_E, obs_X, obs_A, obs_E)
    out = jax.block_until_ready(out)

    assert out.shape == (B,)
    # mirrors the module's `assert torch.all(-1 * score >= -1e-05)`
    assert bool(jnp.all(out >= -1e-5))
    print("KERNEL_OK")
</pallas_src>

<mosaic_0001>
module attributes {stable_mosaic.version = 11 : i64} {
  func.func @_aff_kernel(%arg0: i32, %arg1: memref<2x6x4xf32, #tpu.memory_space<vmem>>, %arg2: memref<2x6x4xf32, #tpu.memory_space<vmem>>, %arg3: memref<2x6x6xf32, #tpu.memory_space<vmem>>) attributes {dimension_semantics = [#tpu.dimension_semantics<parallel>], iteration_bounds = array<i64: 1>, scalar_prefetch = 0 : i64, scratch_operands = 0 : i64, tpu.core_type = #tpu.core_type<tc>, window_params = [{transform_indices = @transform_0, window_bounds = array<i64: 2, 6, 4>}, {transform_indices = @transform_1, window_bounds = array<i64: 2, 6, 4>}, {transform_indices = @transform_2, window_bounds = array<i64: 2, 6, 6>}]} {
    %c0 = arith.constant 0 : index
    %c0_0 = arith.constant 0 : index
    %c0_1 = arith.constant 0 : index
    %0 = vector.load %arg1[%c0, %c0_0, %c0_1] : memref<2x6x4xf32, #tpu.memory_space<vmem>>, vector<2x6x4xf32>
    %c0_2 = arith.constant 0 : index
    %c0_3 = arith.constant 0 : index
    %c0_4 = arith.constant 0 : index
    %1 = vector.load %arg2[%c0_2, %c0_3, %c0_4] : memref<2x6x4xf32, #tpu.memory_space<vmem>>, vector<2x6x4xf32>
    "tpu.trace_start"() <{level = 10 : i32, message = "bif,bjf->bij"}> : () -> ()
    %cst = arith.constant dense<0.000000e+00> : vector<2x6x6xf32>
    %2 = tpu.matmul %0, %1, %cst {dimension_numbers = #tpu.dot_dimension_numbers<[2], [2], [1], [1], [0, 0, 0, 1, 1, 1], [0], [0]>} : vector<2x6x4xf32>, vector<2x6x4xf32>, vector<2x6x6xf32> -> vector<2x6x6xf32>
    "tpu.trace_stop"() : () -> ()
    %cst_5 = arith.constant 7.500000e-01 : f32
    %3 = vector.broadcast %cst_5 : f32 to vector<2x6x6xf32>
    %4 = arith.subf %2, %3 : vector<2x6x6xf32>
    %c0_6 = arith.constant 0 : index
    %c0_7 = arith.constant 0 : index
    %c0_8 = arith.constant 0 : index
    %5 = vector.load %arg3[%c0_6, %c0_7, %c0_8] : memref<2x6x6xf32, #tpu.memory_space<vmem>>, vector<2x6x6xf32>
    tpu.vector_store %arg3[%c0_6, %c0_7, %c0_8], %4 {strides = array<i32>} : memref<2x6x6xf32, #tpu.memory_space<vmem>>, vector<2x6x6xf32>,
    return
  }
  func.func @transform_0(%arg0: i32) -> (i32, i32, i32) {
    %c0_i32 = arith.constant 0 : i32
    %c0_i32_0 = arith.constant 0 : i32
    %c0_i32_1 = arith.constant 0 : i32
    return %arg0, %c0_i32, %c0_i32_0 : i32, i32, i32
  }
  func.func @transform_1(%arg0: i32) -> (i32, i32, i32) {
    %c0_i32 = arith.constant 0 : i32
    %c0_i32_0 = arith.constant 0 : i32
    %c0_i32_1 = arith.constant 0 : i32
    return %arg0, %c0_i32, %c0_i32_0 : i32, i32, i32
  }
  func.func @transform_2(%arg0: i32) -> (i32, i32, i32) {
    %c0_i32 = arith.constant 0 : i32
    %c0_i32_0 = arith.constant 0 : i32
    %c0_i32_1 = arith.constant 0 : i32
    return %arg0, %c0_i32, %c0_i32_0 : i32, i32, i32
  }
}

module attributes {stable_mosaic.version = 11 : i64} {
  func.func @_aff_kernel(%arg0: i32, %arg1: memref<2x4x6xf32, #tpu.memory_space<vmem>>, %arg2: memref<2x4x6xf32, #tpu.memory_space<vmem>>, %arg3: memref<2x4x4xf32, #tpu.memory_space<vmem>>) attributes {dimension_semantics = [#tpu.dimension_semantics<parallel>], iteration_bounds = array<i64: 1>, scalar_prefetch = 0 : i64, scratch_operands = 0 : i64, tpu.core_type = #tpu.core_type<tc>, window_params = [{transform_indices = @transform_0, window_bounds = array<i64: 2, 4, 6>}, {transform_indices = @transform_1, window_bounds = array<i64: 2, 4, 6>}, {transform_indices = @transform_2, window_bounds = array<i64: 2, 4, 4>}]} {
    %c0 = arith.constant 0 : index
    %c0_0 = arith.constant 0 : index
    %c0_1 = arith.constant 0 : index
    %0 = vector.load %arg1[%c0, %c0_0, %c0_1] : memref<2x4x6xf32, #tpu.memory_space<vmem>>, vector<2x4x6xf32>
    %c0_2 = arith.constant 0 : index
    %c0_3 = arith.constant 0 : index
    %c0_4 = arith.constant 0 : index
    %1 = vector.load %arg2[%c0_2, %c0_3, %c0_4] : memref<2x4x6xf32, #tpu.memory_space<vmem>>, vector<2x4x6xf32>
    "tpu.trace_start"() <{level = 10 : i32, message = "bif,bjf->bij"}> : () -> ()
    %cst = arith.constant dense<0.000000e+00> : vector<2x4x4xf32>
    %2 = tpu.matmul %0, %1, %cst {dimension_numbers = #tpu.dot_dimension_numbers<[2], [2], [1], [1], [0, 0, 0, 1, 1, 1], [0], [0]>} : vector<2x4x6xf32>, vector<2x4x6xf32>, vector<2x4x4xf32> -> vector<2x4x4xf32>
    "tpu.trace_stop"() : () -> ()
    %cst_5 = arith.constant 7.500000e-01 : f32
    %3 = vector.broadcast %cst_5 : f32 to vector<2x4x4xf32>
    %4 = arith.subf %2, %3 : vector<2x4x4xf32>
    %c0_6 = arith.constant 0 : index
    %c0_7 = arith.constant 0 : index
    %c0_8 = arith.constant 0 : index
    %5 = vector.load %arg3[%c0_6, %c0_7, %c0_8] : memref<2x4x4xf32, #tpu.memory_space<vmem>>, vector<2x4x4xf32>
    tpu.vector_store %arg3[%c0_6, %c0_7, %c0_8], %4 {strides = array<i32>} : memref<2x4x4xf32, #tpu.memory_space<vmem>>, vector<2x4x4xf32>,
    return
  }
  func.func @transform_0(%arg0: i32) -> (i32, i32, i32) {
    %c0_i32 = arith.constant 0 : i32
    %c0_i32_0 = arith.constant 0 : i32
    %c0_i32_1 = arith.constant 0 : i32
    return %arg0, %c0_i32, %c0_i32_0 : i32, i32, i32
  }
  func.func @transform_1(%arg0: i32) -> (i32, i32, i32) {
    %c0_i32 = arith.constant 0 : i32
    %c0_i32_0 = arith.constant 0 : i32
    %c0_i32_1 = arith.constant 0 : i32
    return %arg0, %c0_i32, %c0_i32_0 : i32, i32, i32
  }
  func.func @transform_2(%arg0: i32) -> (i32, i32, i32) {
    %c0_i32 = arith.constant 0 : i32
    %c0_i32_0 = arith.constant 0 : i32
    %c0_i32_1 = arith.constant 0 : i32
    return %arg0, %c0_i32, %c0_i32_0 : i32, i32, i32
  }
}

module attributes {stable_mosaic.version = 11 : i64} {
  func.func @_rrwm_kernel(%arg0: i32, %arg1: memref<2x16x16xf32, #tpu.memory_space<vmem>>, %arg2: memref<2x1x1xf32, #tpu.memory_space<vmem>>, %arg3: memref<4x16xf32, #tpu.memory_space<vmem>>, %arg4: memref<16x4xf32, #tpu.memory_space<vmem>>, %arg5: memref<4x16xf32, #tpu.memory_space<vmem>>, %arg6: memref<2x1x16xf32, #tpu.memory_space<vmem>>, %arg7: memref<2x16x16xf32, #tpu.memory_space<vmem>>) attributes {dimension_semantics = [#tpu.dimension_semantics<parallel>], iteration_bounds = array<i64: 1>, scalar_prefetch = 0 : i64, scratch_operands = 1 : i64, tpu.core_type = #tpu.core_type<tc>, window_params = [{transform_indices = @transform_0, window_bounds = array<i64: 2, 16, 16>}, {transform_indices = @transform_1, window_bounds = array<i64: 2, 1, 1>}, {pipeline_mode = #tpu.pipeline_mode<synchronous>, transform_indices = @transform_2, window_bounds = array<i64: 4, 16>}, {pipeline_mode = #tpu.pipeline_mode<synchronous>, transform_indices = @transform_3, window_bounds = array<i64: 16, 4>}, {pipeline_mode = #tpu.pipeline_mode<synchronous>, transform_indices = @transform_4, window_bounds = array<i64: 4, 16>}, {transform_indices = @transform_5, window_bounds = array<i64: 2, 1, 16>}]} {
    %c0 = arith.constant 0 : index
    %c0_0 = arith.constant 0 : index
    %c0_1 = arith.constant 0 : index
    %0 = vector.load %arg1[%c0, %c0_0, %c0_1] : memref<2x16x16xf32, #tpu.memory_space<vmem>>, vector<1x16x16xf32>
    %1 = vector.shape_cast %0 : vector<1x16x16xf32> to vector<16x16xf32>
    %c0_2 = arith.constant 0 : index
    %c0_3 = arith.constant 0 : index
    %c0_4 = arith.constant 0 : index
    %2 = vector.load %arg2[%c0_2, %c0_3, %c0_4] : memref<2x1x1xf32, #tpu.memory_space<vmem>>, vector<1x1x1xf32>
    %3 = vector.shape_cast %2 : vector<1x1x1xf32> to vector<1x1xf32>
    %4 = vector.broadcast %3 : vector<1x1xf32> to vector<16x16xf32>
    %5 = arith.mulf %1, %4 : vector<16x16xf32>
    %c0_5 = arith.constant 0 : index
    %c0_6 = arith.constant 0 : index
    %c0_7 = arith.constant 0 : index
    %6 = vector.load %arg7[%c0_5, %c0_6, %c0_7] : memref<2x16x16xf32, #tpu.memory_space<vmem>>, vector<1x16x16xf32>
    %7 = vector.shape_cast %6 : vector<1x16x16xf32> to vector<16x16xf32>
    %8 = vector.shape_cast %5 : vector<16x16xf32> to vector<1x16x16xf32>
    tpu.vector_store %arg7[%c0_5, %c0_6, %c0_7], %8 {strides = array<i32>} : memref<2x16x16xf32, #tpu.memory_space<vmem>>, vector<1x16x16xf32>,
    %c1 = arith.constant 1 : index
    %c0_8 = arith.constant 0 : index
    %c0_9 = arith.constant 0 : index
    %9 = vector.load %arg1[%c1, %c0_8, %c0_9] : memref<2x16x16xf32, #tpu.memory_space<vmem>>, vector<1x16x16xf32>
    %10 = vector.shape_cast %9 : vector<1x16x16xf32> to vector<16x16xf32>
    %c1_10 = arith.constant 1 : index
    %c0_11 = arith.constant 0 : index
    %c0_12 = arith.constant 0 : index
    %11 = vector.load %arg2[%c1_10, %c0_11, %c0_12] : memref<2x1x1xf32, #tpu.memory_space<vmem>>, vector<1x1x1xf32>
    %12 = vector.shape_cast %11 : vector<1x1x1xf32> to vector<1x1xf32>
    %13 = vector.broadcast %12 : vector<1x1xf32> to vector<16x16xf32>
    %14 = arith.mulf %10, %13 : vector<16x16xf32>
    %c1_13 = arith.constant 1 : index
    %c0_14 = arith.constant 0 : index
    %c0_15 = arith.constant 0 : index
    %15 = vector.load %arg7[%c1_13, %c0_14, %c0_15] : memref<2x16x16xf32, #tpu.memory_space<vmem>>, vector<1x16x16xf32>
    %16 = vector.shape_cast %15 : vector<1x16x16xf32> to vector<16x16xf32>
    %17 = vector.shape_cast %14 : vector<16x16xf32> to vector<1x16x16xf32>
    tpu.vector_store %arg7[%c1_13, %c0_14, %c0_15], %17 {strides = array<i32>} : memref<2x16x16xf32, #tpu.memory_space<vmem>>, vector<1x16x16xf32>,
    %c0_16 = arith.constant 0 : index
    %c0_17 = arith.constant 0 : index
    %18 = vector.load %arg3[%c0_16, %c0_17] : memref<4x16xf32, #tpu.memory_space<vmem>>, vector<4x16xf32>
    %c0_18 = arith.constant 0 : index
    %c0_19 = arith.constant 0 : index
    %19 = vector.load %arg4[%c0_18, %c0_19] : memref<16x4xf32, #tpu.memory_space<vmem>>, vector<16x4xf32>
    %c0_20 = arith.constant 0 : index
    %c0_21 = arith.constant 0 : index
    %20 = vector.load %arg5[%c0_20, %c0_21] : memref<4x16xf32, #tpu.memory_space<vmem>>, vector<4x16xf32>
    %cst = arith.constant 6.250000e-02 : f32
    %21 = vector.broadcast %cst : f32 to vector<1x16xf32>
    %cst_22 = arith.constant 6.250000e-02 : f32
    %22 = vector.broadcast %cst_22 : f32 to vector<1x16xf32>
    %cst_23 = arith.constant 0.000000e+00 : f32
    %23 = vector.broadcast %cst_23 : f32 to vector<1x1xf32>
    %cst_24 = arith.constant 0.000000e+00 : f32
    %24 = vector.broadcast %cst_24 : f32 to vector<1x1xf32>
    %c0_i32 = arith.constant 0 : i32
    %c50_i32 = arith.constant 50 : i32
    %25 = arith.addi %c0_i32, %c50_i32 : i32
    %c1_i32 = arith.constant 1 : i32
    %26:4 = scf.for %arg8 = %c0_i32 to %25 step %c1_i32 iter_args(%arg9 = %21, %arg10 = %22, %arg11 = %23, %arg12 = %24) -> (vector<1x16xf32>, vector<1x16xf32>, vector<1x1xf32>, vector<1x1xf32>)  : i32 {
      %c0_31 = arith.constant 0 : index
      %c0_32 = arith.constant 0 : index
      %c0_33 = arith.constant 0 : index
      %33 = vector.load %arg7[%c0_31, %c0_32, %c0_33] : memref<2x16x16xf32, #tpu.memory_space<vmem>>, vector<1x16x16xf32>
      %34 = vector.shape_cast %33 : vector<1x16x16xf32> to vector<16x16xf32>
      %cst_34 = arith.constant dense<0.000000e+00> : vector<1x16xf32>
      %35 = tpu.matmul %arg9, %34, %cst_34 {dimension_numbers = #tpu.dot_dimension_numbers<[1], [0], [0], [1], [0, 0, 1, 1], [], []>} : vector<1x16xf32>, vector<16x16xf32>, vector<1x16xf32> -> vector<1x16xf32>
      %36 = math.absf %35 : vector<1x16xf32>
      %cst_35 = arith.constant dense<0.000000e+00> : vector<1xf32>
      %37 = vector.multi_reduction <add>, %36, %cst_35 [1] : vector<1x16xf32> to vector<1xf32>
      %38 = vector.shape_cast %37 : vector<1xf32> to vector<1x1xf32>
      %39 = tpu.reciprocal %38 {approx = true} : vector<1x1xf32> -> vector<1x1xf32>
      %40 = vector.broadcast %39 : vector<1x1xf32> to vector<1x16xf32>
      %41 = arith.mulf %35, %40 : vector<1x16xf32>
      %42 = vector.broadcast %41 : vector<1x16xf32> to vector<4x16xf32>
      %43 = arith.mulf %18, %42 : vector<4x16xf32>
      %cst_36 = arith.constant dense<0.000000e+00> : vector<4x4xf32>
      %44 = tpu.matmul %43, %19, %cst_36 {dimension_numbers = #tpu.dot_dimension_numbers<[1], [0], [0], [1], [0, 0, 1, 1], [], []>} : vector<4x16xf32>, vector<16x4xf32>, vector<4x4xf32> -> vector<4x4xf32>
      %cst_37 = arith.constant dense<0xFF800000> : vector<4xf32>
      %45 = vector.multi_reduction <maximumf>, %44, %cst_37 [1] : vector<4x4xf32> to vector<4xf32>
      %46 = vector.shape_cast %45 : vector<4xf32> to vector<4x1xf32>
      %cst_38 = arith.constant dense<0xFF800000> : vector<1xf32>
      %47 = vector.multi_reduction <maximumf>, %46, %cst_38 [0] : vector<4x1xf32> to vector<1xf32>
      %48 = vector.shape_cast %47 : vector<1xf32> to vector<1x1xf32>
      %cst_39 = arith.constant 3.000000e+01 : f32
      %49 = vector.broadcast %cst_39 : f32 to vector<4x4xf32>
      %50 = arith.mulf %49, %44 : vector<4x4xf32>
      %51 = vector.broadcast %48 : vector<1x1xf32> to vector<4x4xf32>
      %52 = arith.divf %50, %51 : vector<4x4xf32>
      %c0_i32_40 = arith.constant 0 : i32
      %c10_i32 = arith.constant 10 : i32
      %53 = arith.addi %c0_i32_40, %c10_i32 : i32
      %c1_i32_41 = arith.constant 1 : i32
      %54 = scf.for %arg13 = %c0_i32_40 to %53 step %c1_i32_41 iter_args(%arg14 = %52) -> (vector<4x4xf32>)  : i32 {
        %cst_70 = arith.constant dense<0xFF800000> : vector<4xf32>
        %141 = vector.multi_reduction <maximumf>, %arg14, %cst_70 [0] : vector<4x4xf32> to vector<4xf32>
        %142 = vector.shape_cast %141 : vector<4xf32> to vector<1x4xf32>
        %143 = vector.broadcast %142 : vector<1x4xf32> to vector<4x4xf32>
        %144 = arith.subf %arg14, %143 : vector<4x4xf32>
        %145 = math.exp %144 : vector<4x4xf32>
        %cst_71 = arith.constant dense<0.000000e+00> : vector<4xf32>
        %146 = vector.multi_reduction <add>, %145, %cst_71 [0] : vector<4x4xf32> to vector<4xf32>
        %147 = vector.shape_cast %146 : vector<4xf32> to vector<1x4xf32>
        %148 = math.log %147 : vector<1x4xf32>
        %149 = arith.addf %142, %148 : vector<1x4xf32>
        %150 = vector.broadcast %149 : vector<1x4xf32> to vector<4x4xf32>
        %151 = arith.subf %arg14, %150 : vector<4x4xf32>
        %cst_72 = arith.constant dense<0xFF800000> : vector<4xf32>
        %152 = vector.multi_reduction <maximumf>, %151, %cst_72 [1] : vector<4x4xf32> to vector<4xf32>
        %153 = vector.shape_cast %152 : vector<4xf32> to vector<4x1xf32>
        %154 = vector.broadcast %153 : vector<4x1xf32> to vector<4x4xf32>
        %155 = arith.subf %151, %154 : vector<4x4xf32>
        %156 = math.exp %155 : vector<4x4xf32>
        %cst_73 = arith.constant dense<0.000000e+00> : vector<4xf32>
        %157 = vector.multi_reduction <add>, %156, %cst_73 [1] : vector<4x4xf32> to vector<4xf32>
        %158 = vector.shape_cast %157 : vector<4xf32> to vector<4x1xf32>
        %159 = math.log %158 : vector<4x1xf32>
        %160 = arith.addf %153, %159 : vector<4x1xf32>
        %161 = vector.broadcast %160 : vector<4x1xf32> to vector<4x4xf32>
        %162 = arith.subf %151, %161 : vector<4x4xf32>
        scf.yield %162 : vector<4x4xf32>
      }
      %55 = math.exp %54 : vector<4x4xf32>
      %cst_42 = arith.constant dense<0.000000e+00> : vector<4x16xf32>
      %56 = tpu.matmul %55, %20, %cst_42 {dimension_numbers = #tpu.dot_dimension_numbers<[1], [0], [0], [1], [0, 0, 1, 1], [], []>} : vector<4x4xf32>, vector<4x16xf32>, vector<4x16xf32> -> vector<4x16xf32>
      %57 = arith.mulf %18, %56 : vector<4x16xf32>
      %cst_43 = arith.constant dense<0.000000e+00> : vector<16xf32>
      %58 = vector.multi_reduction <add>, %57, %cst_43 [0] : vector<4x16xf32> to vector<16xf32>
      %59 = vector.shape_cast %58 : vector<16xf32> to vector<1x16xf32>
      %cst_44 = arith.constant 2.000000e-01 : f32
      %60 = vector.broadcast %cst_44 : f32 to vector<1x16xf32>
      %61 = arith.mulf %60, %59 : vector<1x16xf32>
      %cst_45 = arith.constant 8.000000e-01 : f32
      %62 = vector.broadcast %cst_45 : f32 to vector<1x16xf32>
      %63 = arith.mulf %62, %41 : vector<1x16xf32>
      %64 = arith.addf %61, %63 : vector<1x16xf32>
      %65 = math.absf %64 : vector<1x16xf32>
      %cst_46 = arith.constant dense<0.000000e+00> : vector<1xf32>
      %66 = vector.multi_reduction <add>, %65, %cst_46 [1] : vector<1x16xf32> to vector<1xf32>
      %67 = vector.shape_cast %66 : vector<1xf32> to vector<1x1xf32>
      %68 = tpu.reciprocal %67 {approx = true} : vector<1x1xf32> -> vector<1x1xf32>
      %69 = vector.broadcast %68 : vector<1x1xf32> to vector<1x16xf32>
      %70 = arith.mulf %64, %69 : vector<1x16xf32>
      %71 = arith.subf %70, %35 : vector<1x16xf32>
      %72 = arith.mulf %71, %71 : vector<1x16xf32>
      %cst_47 = arith.constant dense<0.000000e+00> : vector<1xf32>
      %73 = vector.multi_reduction <add>, %72, %cst_47 [1] : vector<1x16xf32> to vector<1xf32>
      %74 = vector.shape_cast %73 : vector<1xf32> to vector<1x1xf32>
      %cst_48 = arith.constant 1.000000e-10 : f32
      %75 = vector.broadcast %cst_48 : f32 to vector<1x1xf32>
      %76 = arith.cmpf olt, %74, %75 : vector<1x1xf32>
      %77 = arith.extui %76 : vector<1x1xi1> to vector<1x1xi32>
      %78 = arith.sitofp %77 : vector<1x1xi32> to vector<1x1xf32>
      %79 = arith.maximumf %arg11, %78 : vector<1x1xf32>
      %80 = vector.broadcast %arg11 : vector<1x1xf32> to vector<1x16xf32>
      %81 = arith.mulf %80, %arg9 : vector<1x16xf32>
      %cst_49 = arith.constant 1.000000e+00 : f32
      %82 = vector.broadcast %cst_49 : f32 to vector<1x1xf32>
      %83 = arith.subf %82, %arg11 : vector<1x1xf32>
      %84 = vector.broadcast %83 : vector<1x1xf32> to vector<1x16xf32>
      %85 = arith.mulf %84, %70 : vector<1x16xf32>
      %86 = arith.addf %81, %85 : vector<1x16xf32>
      %c1_50 = arith.constant 1 : index
      %c0_51 = arith.constant 0 : index
      %c0_52 = arith.constant 0 : index
      %87 = vector.load %arg7[%c1_50, %c0_51, %c0_52] : memref<2x16x16xf32, #tpu.memory_space<vmem>>, vector<1x16x16xf32>
      %88 = vector.shape_cast %87 : vector<1x16x16xf32> to vector<16x16xf32>
      %cst_53 = arith.constant dense<0.000000e+00> : vector<1x16xf32>
      %89 = tpu.matmul %arg10, %88, %cst_53 {dimension_numbers = #tpu.dot_dimension_numbers<[1], [0], [0], [1], [0, 0, 1, 1], [], []>} : vector<1x16xf32>, vector<16x16xf32>, vector<1x16xf32> -> vector<1x16xf32>
      %90 = math.absf %89 : vector<1x16xf32>
      %cst_54 = arith.constant dense<0.000000e+00> : vector<1xf32>
      %91 = vector.multi_reduction <add>, %90, %cst_54 [1] : vector<1x16xf32> to vector<1xf32>
      %92 = vector.shape_cast %91 : vector<1xf32> to vector<1x1xf32>
      %93 = tpu.reciprocal %92 {approx = true} : vector<1x1xf32> -> vector<1x1xf32>
      %94 = vector.broadcast %93 : vector<1x1xf32> to vector<1x16xf32>
      %95 = arith.mulf %89, %94 : vector<1x16xf32>
      %96 = vector.broadcast %95 : vector<1x16xf32> to vector<4x16xf32>
      %97 = arith.mulf %18, %96 : vector<4x16xf32>
      %cst_55 = arith.constant dense<0.000000e+00> : vector<4x4xf32>
      %98 = tpu.matmul %97, %19, %cst_55 {dimension_numbers = #tpu.dot_dimension_numbers<[1], [0], [0], [1], [0, 0, 1, 1], [], []>} : vector<4x16xf32>, vector<16x4xf32>, vector<4x4xf32> -> vector<4x4xf32>
      %cst_56 = arith.constant dense<0xFF800000> : vector<4xf32>
      %99 = vector.multi_reduction <maximumf>, %98, %cst_56 [1] : vector<4x4xf32> to vector<4xf32>
      %100 = vector.shape_cast %99 : vector<4xf32> to vector<4x1xf32>
      %cst_57 = arith.constant dense<0xFF800000> : vector<1xf32>
      %101 = vector.multi_reduction <maximumf>, %100, %cst_57 [0] : vector<4x1xf32> to vector<1xf32>
      %102 = vector.shape_cast %101 : vector<1xf32> to vector<1x1xf32>
      %cst_58 = arith.constant 3.000000e+01 : f32
      %103 = vector.broadcast %cst_58 : f32 to vector<4x4xf32>
      %104 = arith.mulf %103, %98 : vector<4x4xf32>
      %105 = vector.broadcast %102 : vector<1x1xf32> to vector<4x4xf32>
      %106 = arith.divf %104, %105 : vector<4x4xf32>
      %c0_i32_59 = arith.constant 0 : i32
      %c10_i32_60 = arith.constant 10 : i32
      %107 = arith.addi %c0_i32_59, %c10_i32_60 : i32
      %c1_i32_61 = arith.constant 1 : i32
      %108 = scf.for %arg13 = %c0_i32_59 to %107 step %c1_i32_61 iter_args(%arg14 = %106) -> (vector<4x4xf32>)  : i32 {
        %cst_70 = arith.constant dense<0xFF800000> : vector<4xf32>
        %141 = vector.multi_reduction <maximumf>, %arg14, %cst_70 [0] : vector<4x4xf32> to vector<4xf32>
        %142 = vector.shape_cast %141 : vector<4xf32> to vector<1x4xf32>
        %143 = vector.broadcast %142 : vector<1x4xf32> to vector<4x4xf32>
        %144 = arith.subf %arg14, %143 : vector<4x4xf32>
        %145 = math.exp %144 : vector<4x4xf32>
        %cst_71 = arith.constant dense<0.000000e+00> : vector<4xf32>
        %146 = vector.multi_reduction <add>, %145, %cst_71 [0] : vector<4x4xf32> to vector<4xf32>
        %147 = vector.shape_cast %146 : vector<4xf32> to vector<1x4xf32>
        %148 = math.log %147 : vector<1x4xf32>
        %149 = arith.addf %142, %148 : vector<1x4xf32>
        %150 = vector.broadcast %149 : vector<1x4xf32> to vector<4x4xf32>
        %151 = arith.subf %arg14, %150 : vector<4x4xf32>
        %cst_72 = arith.constant dense<0xFF800000> : vector<4xf32>
        %152 = vector.multi_reduction <maximumf>, %151, %cst_72 [1] : vector<4x4xf32> to vector<4xf32>
        %153 = vector.shape_cast %152 : vector<4xf32> to vector<4x1xf32>
        %154 = vector.broadcast %153 : vector<4x1xf32> to vector<4x4xf32>
        %155 = arith.subf %151, %154 : vector<4x4xf32>
        %156 = math.exp %155 : vector<4x4xf32>
        %cst_73 = arith.constant dense<0.000000e+00> : vector<4xf32>
        %157 = vector.multi_reduction <add>, %156, %cst_73 [1] : vector<4x4xf32> to vector<4xf32>
        %158 = vector.shape_cast %157 : vector<4xf32> to vector<4x1xf32>
        %159 = math.log %158 : vector<4x1xf32>
        %160 = arith.addf %153, %159 : vector<4x1xf32>
        %161 = vector.broadcast %160 : vector<4x1xf32> to vector<4x4xf32>
        %162 = arith.subf %151, %161 : vector<4x4xf32>
        scf.yield %162 : vector<4x4xf32>
      }
      %109 = math.exp %108 : vector<4x4xf32>
      %cst_62 = arith.constant dense<0.000000e+00> : vector<4x16xf32>
      %110 = tpu.matmul %109, %20, %cst_62 {dimension_numbers = #tpu.dot_dimension_numbers<[1], [0], [0], [1], [0, 0, 1, 1], [], []>} : vector<4x4xf32>, vector<4x16xf32>, vector<4x16xf32> -> vector<4x16xf32>
      %111 = arith.mulf %18, %110 : vector<4x16xf32>
      %cst_63 = arith.constant dense<0.000000e+00> : vector<16xf32>
      %112 = vector.multi_reduction <add>, %111, %cst_63 [0] : vector<4x16xf32> to vector<16xf32>
      %113 = vector.shape_cast %112 : vector<16xf32> to vector<1x16xf32>
      %cst_64 = arith.constant 2.000000e-01 : f32
      %114 = vector.broadcast %cst_64 : f32 to vector<1x16xf32>
      %115 = arith.mulf %114, %113 : vector<1x16xf32>
      %cst_65 = arith.constant 8.000000e-01 : f32
      %116 = vector.broadcast %cst_65 : f32 to vector<1x16xf32>
      %117 = arith.mulf %116, %95 : vector<1x16xf32>
      %118 = arith.addf %115, %117 : vector<1x16xf32>
      %119 = math.absf %118 : vector<1x16xf32>
      %cst_66 = arith.constant dense<0.000000e+00> : vector<1xf32>
      %120 = vector.multi_reduction <add>, %119, %cst_66 [1] : vector<1x16xf32> to vector<1xf32>
      %121 = vector.shape_cast %120 : vector<1xf32> to vector<1x1xf32>
      %122 = tpu.reciprocal %121 {approx = true} : vector<1x1xf32> -> vector<1x1xf32>
      %123 = vector.broadcast %122 : vector<1x1xf32> to vector<1x16xf32>
      %124 = arith.mulf %118, %123 : vector<1x16xf32>
      %125 = arith.subf %124, %89 : vector<1x16xf32>
      %126 = arith.mulf %125, %125 : vector<1x16xf32>
      %cst_67 = arith.constant dense<0.000000e+00> : vector<1xf32>
      %127 = vector.multi_reduction <add>, %126, %cst_67 [1] : vector<1x16xf32> to vector<1xf32>
      %128 = vector.shape_cast %127 : vector<1xf32> to vector<1x1xf32>
      %cst_68 = arith.constant 1.000000e-10 : f32
      %129 = vector.broadcast %cst_68 : f32 to vector<1x1xf32>
      %130 = arith.cmpf olt, %128, %129 : vector<1x1xf32>
      %131 = arith.extui %130 : vector<1x1xi1> to vector<1x1xi32>
      %132 = arith.sitofp %131 : vector<1x1xi32> to vector<1x1xf32>
      %133 = arith.maximumf %arg12, %132 : vector<1x1xf32>
      %134 = vector.broadcast %arg12 : vector<1x1xf32> to vector<1x16xf32>
      %135 = arith.mulf %134, %arg10 : vector<1x16xf32>
      %cst_69 = arith.constant 1.000000e+00 : f32
      %136 = vector.broadcast %cst_69 : f32 to vector<1x1xf32>
      %137 = arith.subf %136, %arg12 : vector<1x1xf32>
      %138 = vector.broadcast %137 : vector<1x1xf32> to vector<1x16xf32>
      %139 = arith.mulf %138, %124 : vector<1x16xf32>
      %140 = arith.addf %135, %139 : vector<1x16xf32>
      scf.yield %86, %140, %79, %133 : vector<1x16xf32>, vector<1x16xf32>, vector<1x1xf32>, vector<1x1xf32>
    }
    %c0_25 = arith.constant 0 : index
    %c0_26 = arith.constant 0 : index
    %c0_27 = arith.constant 0 : index
    %27 = vector.load %arg6[%c0_25, %c0_26, %c0_27] : memref<2x1x16xf32, #tpu.memory_space<vmem>>, vector<1x1x16xf32>
    %28 = vector.shape_cast %27 : vector<1x1x16xf32> to vector<1x16xf32>
    %29 = vector.shape_cast %26#0 : vector<1x16xf32> to vector<1x1x16xf32>
    tpu.vector_store %arg6[%c0_25, %c0_26, %c0_27], %29 {strides = array<i32>} : memref<2x1x16xf32, #tpu.memory_space<vmem>>, vector<1x1x16xf32>,
    %c1_28 = arith.constant 1 : index
    %c0_29 = arith.constant 0 : index
    %c0_30 = arith.constant 0 : index
    %30 = vector.load %arg6[%c1_28, %c0_29, %c0_30] : memref<2x1x16xf32, #tpu.memory_space<vmem>>, vector<1x1x16xf32>
    %31 = vector.shape_cast %30 : vector<1x1x16xf32> to vector<1x16xf32>
    %32 = vector.shape_cast %26#1 : vector<1x16xf32> to vector<1x1x16xf32>
    tpu.vector_store %arg6[%c1_28, %c0_29, %c0_30], %32 {strides = array<i32>} : memref<2x1x16xf32, #tpu.memory_space<vmem>>, vector<1x1x16xf32>,
    return
  }
  func.func @transform_0(%arg0: i32) -> (i32, i32, i32) {
    %c0_i32 = arith.constant 0 : i32
    %c0_i32_0 = arith.constant 0 : i32
    %c0_i32_1 = arith.constant 0 : i32
    return %arg0, %c0_i32, %c0_i32_0 : i32, i32, i32
  }
  func.func @transform_1(%arg0: i32) -> (i32, i32, i32) {
    %c0_i32 = arith.constant 0 : i32
    %c0_i32_0 = arith.constant 0 : i32
    %c0_i32_1 = arith.constant 0 : i32
    return %arg0, %c0_i32, %c0_i32_0 : i32, i32, i32
  }
  func.func @transform_2(%arg0: i32) -> (i32, i32) {
    %c0_i32 = arith.constant 0 : i32
    %c0_i32_0 = arith.constant 0 : i32
    %c0_i32_1 = arith.constant 0 : i32
    return %c0_i32, %c0_i32_0 : i32, i32
  }
  func.func @transform_3(%arg0: i32) -> (i32, i32) {
    %c0_i32 = arith.constant 0 : i32
    %c0_i32_0 = arith.constant 0 : i32
    %c0_i32_1 = arith.constant 0 : i32
    return %c0_i32, %c0_i32_0 : i32, i32
  }
  func.func @transform_4(%arg0: i32) -> (i32, i32) {
    %c0_i32 = arith.constant 0 : i32
    %c0_i32_0 = arith.constant 0 : i32
    %c0_i32_1 = arith.constant 0 : i32
    return %c0_i32, %c0_i32_0 : i32, i32
  }
  func.func @transform_5(%arg0: i32) -> (i32, i32, i32) {
    %c0_i32 = arith.constant 0 : i32
    %c0_i32_0 = arith.constant 0 : i32
    %c0_i32_1 = arith.constant 0 : i32
    return %arg0, %c0_i32, %c0_i32_0 : i32, i32, i32
  }
}

</mosaic_0001>

<bundles_post_ra>
// kernel: _unnamed_function_.4
= control target key start
LH: loop header
LB: loop body
LE: loop exit
PB: predicated region body
PF: predicated region fallthrough
CT: control target
= control target key end

     0   :  { %vm15_vm0 = vcmask 31744   ;;  %v199_v0 = vmov 0.0   ;;  %vm200_vm1 = vmmov 0   ;;  %vm170_vm2 = vcmask 46080   ;;  %s234_s1 = inlined_call_operand.vmem [shape: f32[2,6,4], index: 1, kind: input, shape index: {}]   ;;  %s235_s0 = inlined_call_operand.vmem [shape: f32[2,6,4], index: 0, kind: input, shape index: {}]   ;;  %s236_s2 = inlined_call_operand.vmem [shape: f32[2,6,6], index: 2, kind: output, shape index: {}]  }
   0x1   :  { %187 = vmatprep.subr.mxu0 %v199_v0  ;;  %192 = vmatprep.subr.mxu1 %v199_v0  ;;  %v13_v1 = vld [vmem:[%s234_s1] sm:$0x3f]  ;;  %v14_v2 = vld [vmem:[%s234_s1 + $0x8] sm:$0x3f] }
   0x2   :  { %188 = vmatpush3.xpose.msk.msra.mxu0 %vm15_vm0, %v13_v1  ;;  %193 = vmatpush3.xpose.msk.msra.mxu1 %vm15_vm0, %v14_v2  ;;  %v11_v3 = vld [vmem:[%s235_s0] sm:$0x3f]  ;;  %v12_v4 = vld [vmem:[%s235_s0 + $0x8] sm:$0x3f] }
   0x3   :  { %189 = vmatprep.mubr.msk.f32.mxu0 %vm200_vm1, %v199_v0  ;;  %194 = vmatprep.mubr.msk.f32.mxu1 %vm200_vm1, %v199_v0 }
   0x5   :  { %190 = vmatmul.mubr.msk.f32.vlgmr.msra.gmra.mxu0 %vm15_vm0, %v11_v3  ;;  %195 = vmatmul.mubr.msk.f32.vlgmr.msra.gmra.mxu1 %vm15_vm0, %v12_v4 }
  0xc5   :  { %v88_v5 = vpop.f32.mrf.mxu0  ;;  %v164_v6 = vpop.f32.mrf.mxu1 }
  0xc6   :  { %v181_v7 = vadd.f32 -0.75, %v88_v5  ;;  %v182_v8 = vadd.f32 -0.75, %v164_v6 }
  0xc7   :  { %v191_v9 = vpop.f32.mrf.mxu0  ;;  %v196_v10 = vpop.f32.mrf.mxu1 }
  0xc8   :  { %171 = vst.msk [vmem:[%s236_s2] sm:$0x3f] %vm170_vm2, %v181_v7  ;;  %172 = vst.msk [vmem:[%s236_s2 + $0x8] sm:$0x3f] %vm170_vm2, %v182_v8 }

// kernel: _unnamed_function_.3
= control target key start
LH: loop header
LB: loop body
LE: loop exit
PB: predicated region body
PF: predicated region fallthrough
CT: control target
= control target key end

     0   :  { %vm15_vm0 = vcmask 48128   ;;  %v199_v0 = vmov 0.0   ;;  %vm200_vm1 = vmmov 0   ;;  %vm170_vm2 = vcmask 27648   ;;  %s234_s1 = inlined_call_operand.vmem [shape: f32[2,4,6], index: 1, kind: input, shape index: {}]   ;;  %s235_s0 = inlined_call_operand.vmem [shape: f32[2,4,6], index: 0, kind: input, shape index: {}]   ;;  %s236_s2 = inlined_call_operand.vmem [shape: f32[2,4,4], index: 2, kind: output, shape index: {}]  }
   0x1   :  { %187 = vmatprep.subr.mxu0 %v199_v0  ;;  %192 = vmatprep.subr.mxu1 %v199_v0  ;;  %v13_v1 = vld [vmem:[%s234_s1] sm:$0xf]  ;;  %v14_v2 = vld [vmem:[%s234_s1 + $0x4] sm:$0xf] }
   0x2   :  { %188 = vmatpush3.xpose.msk.msra.mxu0 %vm15_vm0, %v13_v1  ;;  %193 = vmatpush3.xpose.msk.msra.mxu1 %vm15_vm0, %v14_v2  ;;  %v11_v3 = vld [vmem:[%s235_s0] sm:$0xf]  ;;  %v12_v4 = vld [vmem:[%s235_s0 + $0x4] sm:$0xf] }
   0x3   :  { %189 = vmatprep.mubr.msk.f32.mxu0 %vm200_vm1, %v199_v0  ;;  %194 = vmatprep.mubr.msk.f32.mxu1 %vm200_vm1, %v199_v0 }
   0x5   :  { %190 = vmatmul.mubr.msk.f32.vlgmr.msra.gmra.mxu0 %vm15_vm0, %v11_v3  ;;  %195 = vmatmul.mubr.msk.f32.vlgmr.msra.gmra.mxu1 %vm15_vm0, %v12_v4 }
  0xc5   :  { %v88_v5 = vpop.f32.mrf.mxu0  ;;  %v164_v6 = vpop.f32.mrf.mxu1 }
  0xc6   :  { %v181_v7 = vadd.f32 -0.75, %v88_v5  ;;  %v182_v8 = vadd.f32 -0.75, %v164_v6 }
  0xc7   :  { %v191_v9 = vpop.f32.mrf.mxu0  ;;  %v196_v10 = vpop.f32.mrf.mxu1 }
  0xc8   :  { %171 = vst.msk [vmem:[%s236_s2] sm:$0xf] %vm170_vm2, %v181_v7  ;;  %172 = vst.msk [vmem:[%s236_s2 + $0x4] sm:$0xf] %vm170_vm2, %v182_v8 }

// kernel: _unnamed_function_.5
= control target key start
LH: loop header
LB: loop body
LE: loop exit
PB: predicated region body
PF: predicated region fallthrough
CT: control target
= control target key end

     0   :  { %v1005_v0 = vmov 0   ;;  %vm34_vm0 = vcmask 130048   ;;  %v1080_v17 = vmov 0.0   ;;  %v1082_v18 = vmov 0.0   ;;  %s1247_s1 = inlined_call_operand.vmem [shape: f32[2,1,1], index: 1, kind: input, shape index: {}]   ;;  %s1248_s2 = inlined_call_operand.vmem [shape: f32[4,16], index: 2, kind: input, shape index: {}]   ;;  %s1249_s3 = inlined_call_operand.vmem [shape: f32[16,4], index: 3, kind: input, shape index: {}]   ;;  %s1250_s4 = inlined_call_operand.vmem [shape: f32[4,16], index: 4, kind: input, shape index: {}]   ;;  %s1251_s5 = inlined_call_operand.vmem [shape: f32[2,1,16], index: 5, kind: output, shape index: {}]   ;;  %s1252_s0 = inlined_call_operand.vmem [shape: f32[2,16,16], index: 0, kind: input, shape index: {}]  }
   0x1   :  { %900 = vset.pattern.permute.xlu0 %v1005_v0  ;;  %v755_v1 = vld [vmem:[%s1247_s1] ss:$0 sm:$0xff]  ;;  %v759_v2 = vld [vmem:[%s1247_s1 + $0x1] ss:$0 sm:$0xff]  ;;  %v1057_v5 = vld [vmem:[%s1249_s3 + $0x8] sm:$0xff]  ;;  %v1084_v19 = vmov 0.0625  }
   0x2   :  { %29 = vperm.xlu0 %900, %v755_v1   ;;  %v1047_v3 = vld [vmem:[%s1248_s2] sm:$0xf]  ;;  %v21_v8 = vld [vmem:[%s1252_s0 + $0x8] sm:$0xff]  ;;  %v756_v12 = vld [vmem:[%s1252_s0 + $0x10] sm:$0xff]  ;;  %v1086_v20 = vmov 0.0625  }
   0x3   :  { %v1052_v4 = vld [vmem:[%s1249_s3] sm:$0xff]  ;;  %v757_v13 = vld [vmem:[%s1252_s0 + $0x18] sm:$0xff] }
   0x4   :  { %v1062_v6 = vld [vmem:[%s1250_s4] sm:$0xf] }
   0x5   :  { %v20_v7 = vld [vmem:[%s1252_s0] sm:$0xff]  ;;  %s1088_s0 = smov 0  }
   0x6   :  { %48 = vperm.xlu0 %900, %v759_v2  }
  0x7d   :  { %v30_v9 = vpop.permute.xlu0 %29 }
  0x7e   :  { %v32_v10 = vmul.f32 %v30_v9, %v20_v7  ;;  %v33_v11 = vmul.f32 %v30_v9, %v21_v8 }
  0x80   :  { %35 = vst.msk [vmem:[#allocation2] sm:$0xff] %vm34_vm0, %v32_v10  ;;  %36 = vst.msk [vmem:[#allocation2 + $0x8] sm:$0xff] %vm34_vm0, %v33_v11 }
  0x81   :  { %v49_v14 = vpop.permute.xlu0 %48 }
  0x82   :  { %v51_v15 = vmul.f32 %v756_v12, %v49_v14  ;;  %v52_v16 = vmul.f32 %v757_v13, %v49_v14 }
  0x84   :  { %54 = vst.msk [vmem:[#allocation2 + $0x10] sm:$0xff] %vm34_vm0, %v51_v15  ;;  %55 = vst.msk [vmem:[#allocation2 + $0x18] sm:$0xff] %vm34_vm0, %v52_v16 }
  0x85 LB: > { %v1006_v22 = vmov 0.0   ;;  %vm1007_vm1 = vmmov 0   ;;  %vm146_vm2 = vcmask 122880   ;;  %v152_v29 = vlaneseq  ;;  %s1134_s9 = smov 0   ;;  %s987_s0 = sphi %s1088_s0, %s65_s0   ;;  %v983_v20 = vphi %v1086_v20, %v1256_v20   ;;  %v979_v19 = vphi %v1084_v19, %v1255_v19   ;;  %v975_v18 = vphi %v1082_v18, %v1254_v18   ;;  %v971_v17 = vphi %v1080_v17, %v709_v17  }
  0x86   : > { %787 = vmatprep.subr.mxu0 %v1006_v22  ;;  %794 = vmatprep.subr.mxu1 %v1006_v22  ;;  %vm230_vm3 = vcmask 27648   ;;  %vm234_vm4 = vcmask 1043456  }
  0x87   : > { %v71_v21 = vld [vmem:[#allocation2 + $0x8] sm:$0xff]  ;;  %v70_v23 = vld [vmem:[#allocation2] sm:$0xff]  ;;  %791 = vmatprep.mubr.msk.f32.mxu0 %vm1007_vm1, %v1006_v22  ;;  %795 = vmatpush3.msra.mxu1 %v1057_v5  ;;  %v1121_v30 = vshrl.u32 %v152_v29, 7 }
  0x88   : > { %788 = vmatpush3.msra.mxu0 %v71_v21  ;;  %796 = vmatprep.subr.mxu1 %v1006_v22 }
  0x89   : > { %789 = vmatprep.subr.mxu0 %v1006_v22  ;;  %797 = vmatpush3.msra.mxu1 %v1052_v4  ;;  %v154_v31 = vsub.s32 0, %v1121_v30 }
  0x8a   : > { %790 = vmatpush3.msra.mxu0 %v70_v23  ;;  %798 = vmatprep.mubr.msk.f32.mxu1 %vm1007_vm1, %v1006_v22 }
  0x8b   : > { %792 = vmatmul.mubr.msk.f32.vlgmr.msra.gmra.mxu0 %vm34_vm0, %v983_v20 }
 0x14b   : > { %v1117_v24 = vpop.f32.mrf.mxu0 }
 0x14c   : > { %v145_v25 = vand.u32 2147483647, %v1117_v24 }
 0x14d   : > { %v793_v26 = vpop.f32.mrf.mxu0 }
 0x14e   : > { %v147_v27 = vsel %vm146_vm2, %v145_v25, 0.0 }
 0x14f   : > { %148 = vadd.xlane.f32.xlu0 %v147_v27 }
 0x1d8   : > { %v149_v28 = vpop.xlane.xlu0 %148 }
 0x1d9   : > { %901 = vrcp.f32 %v149_v28 }
 0x1e6   : > { %v902_v32 = vpop.eup %901 }
 0x1e7   : > { %v1125_v33 = vmul.f32 %v902_v32, %v1117_v24 }
 0x1e9   : > { %v155_v34 = vrot.slane %v1125_v33, %v154_v31 }
 0x1eb   : > { %v156_v35 = vmul.f32 %v155_v34, %v1047_v3 }
 0x1ed   : > { %799 = vmatmul.mubr.msk.f32.vlgmr.msra.gmra.mxu1 %vm34_vm0, %v156_v35 }
 0x2ad   : > { %v226_v36 = vpop.f32.mrf.mxu1 }
 0x2ae   : > { %v231_v37 = vsel %vm230_vm3, %v226_v36, -inf  ;;  %v242_v47 = vmul.f32 30.0, %v226_v36 }
 0x2af   : > { %232 = vmax.xlane.f32.xlu0 %v231_v37  ;;  %v800_v38 = vpop.f32.mrf.mxu1 }
 0x338   : > { %v233_v39 = vpop.xlane.xlu0 %232 }
 0x339   : > { %v235_v40 = vsel %vm234_vm4, %v233_v39, -inf }
 0x33a   : > { %v236_v41 = vrot.slane %v235_v40, 4 }
 0x33c   : > { %v237_v42 = vmax.f32 %v235_v40, %v236_v41 }
 0x33e   : > { %v238_v43 = vrot.slane %v237_v42, 2 }
 0x340   : > { %v239_v44 = vmax.f32 %v237_v42, %v238_v43 }
 0x342   : > { %v240_v45 = vrot.slane %v239_v44, 1 }
 0x344   : > { %v241_v46 = vmax.f32 %v239_v44, %v240_v45 }
 0x346   : > { %903 = vrcp.f32 %v241_v46 }
 0x353   : > { %v904_v48 = vpop.eup %903 }
 0x354   : > { %v244_v49 = vmul.f32 %v904_v48, %v242_v47  }
 0x356   : > { %v989_v50 = vmov %v244_v49  }
 0x357 LB: >> { %v252_v51 = vsel %vm230_vm3, %v991_v50, -inf  ;;  %s250_s9 = sadd.s32 1, %s995_s9   ;;  %s995_s9 = sphi %s1134_s9, %s250_s9   ;;  %v991_v50 = vphi %v989_v50, %v990_v50  }
 0x358   : >> { %v253_v52 = vrot.slane %v252_v51, 4  ;;  %p247_p0 = scmp.ge.s32.totalorder %s250_s9, 10  }
 0x359   : > { %806 = vmatprep.subr.mxu1 (%p247_p0), %v1006_v22  ;;  %v397_v29 = vld [vmem:[#allocation2 + $0x18] sm:$0xff] (%p247_p0)  ;;  %v396_v32 = vld [vmem:[#allocation2 + $0x10] sm:$0xff] (%p247_p0)  ;;  %810 = vmatprep.mubr.msk.f32.mxu1 (%p247_p0), %vm1007_vm1, %v1006_v22  ;;  %vm288_vm5 = vcmask (%p247_p0), 31744   ;;  %vm366_vm6 = vcmask (%p247_p0), 125952   ;;  %s1194_s10 = smov (%p247_p0), 0  }
 0x35a   : >> { %v254_v53 = vmax.f32 %v252_v51, %v253_v52  ;;  %807 = vmatpush3.msra.mxu1 (%p247_p0), %v397_v29  ;;  %801 = vmatprep.subr.mxu0 (%p247_p0), %v1006_v22 }
 0x35b   : > { %808 = vmatprep.subr.mxu1 (%p247_p0), %v1006_v22  ;;  %802 = vmatpush3.msk.msra.mxu0 (%p247_p0), %vm234_vm4, %v1062_v6 }
 0x35c   : >> { %v255_v54 = vrot.slane %v254_v53, 2  ;;  %809 = vmatpush3.msra.mxu1 (%p247_p0), %v396_v32  ;;  %803 = vmatprep.mubr.msk.f32.mxu0 (%p247_p0), %vm1007_vm1, %v1006_v22 }
 0x35d   : > { %811 = vmatmul.mubr.msk.f32.vlgmr.msra.gmra.mxu1 (%p247_p0), %vm34_vm0, %v979_v19  ;;  %813 = vmatprep.subr.mxu0 (%p247_p0), %v1006_v22 }
 0x35e   : >> { %v256_v55 = vmax.f32 %v254_v53, %v255_v54 }
 0x360   : >> { %v257_v56 = vrot.slane %v256_v55, 1 }
 0x362   : >> { %v258_v57 = vmax.f32 %v256_v55, %v257_v56 }
 0x364   : >> { %v259_v58 = vsub.f32 %v991_v50, %v258_v57 }
 0x366   : >> { %v260_v59 = vmul.f32 1.442695, %v259_v58 }
 0x368   : >> { %905 = vpow2.f32 %v260_v59 }
 0x375   : >> { %v906_v60 = vpop.eup %905 }
 0x376   : >> { %v262_v61 = vsel %vm230_vm3, %v906_v60, 0.0  ;;  %v393_v60 = vsub.f32 (%p247_p0), 1.0, %v975_v18 }
 0x377   : >> { %v263_v62 = vrot.slane %v262_v61, 4 }
 0x379   : >> { %v264_v63 = vadd.f32 %v263_v62, %v262_v61 }
 0x37b   : >> { %v265_v0 = vrot.slane %v264_v63, 2 }
 0x37d   : >> { %v266_v1 = vadd.f32 %v265_v0, %v264_v63  ;;  %v392_v63 = vmul.f32 (%p247_p0), %v975_v18, %v983_v20 }
 0x37f   : >> { %v267_v2 = vrot.slane %v266_v1, 1 }
 0x381   : >> { %v268_v7 = vadd.f32 %v267_v2, %v266_v1 }
 0x383   : >> { %907 = vlog2.f32 %v268_v7 }
 0x390   : >> { %v908_v8 = vpop.eup %907 }
 0x391   : >> { %v270_v9 = vmul.f32 0.6931472, %v908_v8 }
 0x393   : >> { %v271_v10 = vadd.f32 %v270_v9, %v258_v57 }
 0x395   : >> { %v272_v11 = vsub.f32 %v991_v50, %v271_v10 }
 0x397   : >> { %v273_v12 = vsel %vm230_vm3, %v272_v11, -inf }
 0x398   : >> { %274 = vmax.xlane.f32.xlu0 %v273_v12 }
 0x41d   : > { %v1164_v36 = vpop.f32.mrf.mxu1 (%p247_p0) }
 0x41e   : > { %v471_v37 = vand.u32 (%p247_p0), 2147483647, %v1164_v36 }
 0x41f   : > { %v812_v38 = vpop.f32.mrf.mxu1 (%p247_p0) }
 0x420   : > { %v472_v39 = vsel (%p247_p0), %vm146_vm2, %v471_v37, 0.0 }
 0x421   : >> { %v275_v13 = vpop.xlane.xlu0 %274 }
 0x422   : >> { %v276_v14 = vsub.f32 %v272_v11, %v275_v13 }
 0x424   : >> { %v277_v15 = vmul.f32 1.442695, %v276_v14 }
 0x426   : >> { %909 = vpow2.f32 %v277_v15 }
 0x433   : >> { %v910_v16 = vpop.eup %909 }
 0x434   : >> { %v279_v21 = vsel %vm230_vm3, %v910_v16, 0.0 }
 0x435   : >> { %280 = vadd.xlane.f32.xlu0 %v279_v21 }
 0x439   : > { %473 = vadd.xlane.f32.xlu0 (%p247_p0), %v472_v39 }
 0x4be   : >> { %v281_v23 = vpop.xlane.xlu0 %280 }
 0x4bf   : >> { %911 = vlog2.f32 %v281_v23 }
 0x4c2   : > { %v474_v55 = vpop.xlane.xlu0 (%p247_p0), %473 }
 0x4cc   : >> { %v912_v25 = vpop.eup %911 }
 0x4cd   : >> { %v283_v26 = vmul.f32 0.6931472, %v912_v25 }
 0x4cf   : >> { %v284_v27 = vadd.f32 %v283_v26, %v275_v13  ;;  %249 = sbr.rel (!%p247_p0) target bundleno = 855 (0x357), region = 65 }
 0x4d1   : >> { %v285_v28 = vsub.f32 %v272_v11, %v284_v27  }
 0x4d3   : >> { %v990_v50 = vmov %v285_v28   ;;  %v286_v34 = vmul.f32 (%p247_p0), 1.442695, %v285_v28 }
 0x4d4   : > { %v375_v50 = vmul.f32 0.8, %v1125_v33 }
 0x4d5   : > { %913 = vpow2.f32 %v286_v34 }
 0x4d6   : > { %915 = vrcp.f32 %v474_v55 }
 0x4e2   : > { %v914_v35 = vpop.eup %913 }
 0x4e3   : > { %804 = vmatmul.mubr.msk.f32.vlgmr.msra.gmra.mxu0 %vm288_vm5, %v914_v35  ;;  %v916_v56 = vpop.eup %915 }
 0x4e4   : > { %814 = vmatpush3.msra.mxu0 %v1057_v5  ;;  %817 = vmatprep.mubr.msk.f32.mxu0 %vm1007_vm1, %v1006_v22  ;;  %v1173_v57 = vmul.f32 %v916_v56, %v1164_v36 }
 0x4e5   : > { %815 = vmatprep.subr.mxu0 %v1006_v22 }
 0x4e6   : > { %816 = vmatpush3.msra.mxu0 %v1052_v4  ;;  %v480_v58 = vrot.slane %v1173_v57, %v154_v31 }
 0x4e8   : > { %v481_v59 = vmul.f32 %v480_v58, %v1047_v3 }
 0x4ea   : > { %818 = vmatmul.mubr.msk.f32.vlgmr.msra.gmra.mxu0 %vm34_vm0, %v481_v59 }
 0x5a3   : > { %v361_v40 = vpop.f32.mrf.mxu0 }
 0x5a4   : > { %v365_v41 = vmul.f32 %v361_v40, %v1047_v3 }
 0x5a5   : > { %v805_v42 = vpop.f32.mrf.mxu0 }
 0x5a6   : > { %v367_v43 = vsel %vm366_vm6, %v365_v41, 0.0 }
 0x5a7   : > { %v368_v44 = vrot.slane %v367_v43, 4 }
 0x5a9   : > { %v369_v45 = vadd.f32 %v368_v44, %v367_v43 }
 0x5aa   : > { %v551_v2 = vpop.f32.mrf.mxu0 }
 0x5ab   : > { %v370_v46 = vrot.slane %v369_v45, 2  ;;  %v555_v31 = vsel %vm230_vm3, %v551_v2, -inf  ;;  %v565_v25 = vmul.f32 30.0, %v551_v2 }
 0x5ac   : > { %556 = vmax.xlane.f32.xlu1 %v555_v31  ;;  %v819_v8 = vpop.f32.mrf.mxu0 }
 0x5ad   : > { %v371_v47 = vadd.f32 %v370_v46, %v369_v45 }
 0x5af   : > { %v372_v48 = vrot.slane %v371_v47, 1 }
 0x5b1   : > { %v373_v49 = vadd.f32 %v372_v48, %v371_v47 }
 0x5b3   : > { %v374_v51 = vmul.f32 0.2, %v373_v49 }
 0x5b5   : > { %v376_v52 = vadd.f32 %v375_v50, %v374_v51 }
 0x5b7   : > { %v377_v53 = vand.u32 2147483647, %v376_v52 }
 0x5b9   : > { %v378_v54 = vsel %vm146_vm2, %v377_v53, 0.0 }
 0x5ba   : > { %379 = vadd.xlane.f32.xlu0 %v378_v54 }
 0x635   : > { %v557_v10 = vpop.xlane.xlu1 %556 }
 0x636   : > { %v558_v11 = vsel %vm234_vm4, %v557_v10, -inf }
 0x637   : > { %v559_v12 = vrot.slane %v558_v11, 4 }
 0x639   : > { %v560_v13 = vmax.f32 %v558_v11, %v559_v12 }
 0x63b   : > { %v561_v15 = vrot.slane %v560_v13, 2 }
 0x63d   : > { %v562_v16 = vmax.f32 %v560_v13, %v561_v15 }
 0x63f   : > { %v563_v21 = vrot.slane %v562_v16, 1 }
 0x641   : > { %v564_v23 = vmax.f32 %v562_v16, %v563_v21 }
 0x643   : > { %v380_v33 = vpop.xlane.xlu0 %379 }
 0x644   : > { %917 = vrcp.f32 %v380_v33 }
 0x645   : > { %919 = vrcp.f32 %v564_v23 }
 0x651   : > { %v918_v61 = vpop.eup %917 }
 0x652   : > { %v382_v62 = vmul.f32 %v918_v61, %v376_v52  ;;  %v920_v26 = vpop.eup %919 }
 0x653   : > { %v567_v27 = vmul.f32 %v920_v26, %v565_v25  }
 0x654   : > { %v394_v0 = vmul.f32 %v393_v60, %v382_v62  ;;  %v383_v30 = vsub.f32 %v382_v62, %v1117_v24 }
 0x655   : > { %v997_v28 = vmov %v567_v27  }
 0x656   : > { %v1183_v20 = vadd.f32 %v394_v0, %v392_v63   ;;  %v384_v7 = vmul.f32 %v383_v30, %v383_v30 }
 0x658   : > { %v1253_v1 = vmov %v1183_v20  ;;  %v385_v9 = vsel %vm146_vm2, %v384_v7, 0.0 }
 0x659   : > { %386 = vadd.xlane.f32.xlu1 %v385_v9 }
 0x6e2   : > { %v387_v14 = vpop.xlane.xlu1 %386 }
 0x6e3   : > { %vm388_vm7 = vcmp.lt.f32.partialorder %v387_v14, 1e-10 }
 0x6e4   : > { %v1190_v20 = vsel %vm388_vm7, 1.0, %v1006_v22 }
 0x6e5   : > { %v391_v24 = vmax.f32 %v975_v18, %v1190_v20  }
 0x6e6 LB: >> { %v575_v29 = vsel %vm230_vm3, %v999_v28, -inf  ;;  %s573_s10 = sadd.s32 1, %s1003_s10   ;;  %s1003_s10 = sphi %s1194_s10, %s573_s10   ;;  %v999_v28 = vphi %v997_v28, %v998_v28  }
 0x6e7   : >> { %v576_v32 = vrot.slane %v575_v29, 4  ;;  %p570_p1 = scmp.ge.s32.totalorder %s573_s10, 10  }
 0x6e8   : > { %820 = vmatprep.subr.mxu1 (%p570_p1), %v1006_v22  ;;  %822 = vmatprep.mubr.msk.f32.mxu1 (%p570_p1), %vm1007_vm1, %v1006_v22  ;;  %v693_v16 = vmul.f32 (%p570_p1), 0.8, %v1173_v57  ;;  %s65_s0 = sadd.s32 (%p570_p1), 1, %s987_s0   ;;  %v1254_v18 = vmov (%p570_p1), %v391_v24  ;;  %v1256_v20 = vmov (%p570_p1), %v1253_v1 }
 0x6e9   : >> { %v577_v34 = vmax.f32 %v575_v29, %v576_v32  ;;  %821 = vmatpush3.msk.msra.mxu1 (%p570_p1), %vm234_vm4, %v1062_v6  ;;  %p62_p2 = scmp.ge.s32.totalorder (%p570_p1), %s65_s0, 50  }
 0x6eb   : >> { %v578_v35 = vrot.slane %v577_v34, 2 }
 0x6ed   : >> { %v579_v37 = vmax.f32 %v577_v34, %v578_v35  ;;  %v710_v34 = vmul.f32 (%p570_p1), %v971_v17, %v979_v19 }
 0x6ef   : >> { %v580_v38 = vrot.slane %v579_v37, 1 }
 0x6f1   : >> { %v581_v39 = vmax.f32 %v579_v37, %v580_v38 }
 0x6f3   : >> { %v582_v40 = vsub.f32 %v999_v28, %v581_v39 }
 0x6f5   : >> { %v583_v41 = vmul.f32 1.442695, %v582_v40 }
 0x6f7   : >> { %921 = vpow2.f32 %v583_v41 }
 0x704   : >> { %v922_v42 = vpop.eup %921 }
 0x705   : >> { %v585_v43 = vsel %vm230_vm3, %v922_v42, 0.0 }
 0x706   : >> { %v586_v44 = vrot.slane %v585_v43, 4 }
 0x708   : >> { %v587_v45 = vadd.f32 %v586_v44, %v585_v43 }
 0x70a   : >> { %v588_v46 = vrot.slane %v587_v45, 2 }
 0x70c   : >> { %v589_v47 = vadd.f32 %v588_v46, %v587_v45 }
 0x70e   : >> { %v590_v48 = vrot.slane %v589_v47, 1 }
 0x710   : >> { %v591_v49 = vadd.f32 %v590_v48, %v589_v47 }
 0x712   : >> { %923 = vlog2.f32 %v591_v49 }
 0x71f   : >> { %v924_v50 = vpop.eup %923 }
 0x720   : >> { %v593_v51 = vmul.f32 0.6931472, %v924_v50 }
 0x722   : >> { %v594_v52 = vadd.f32 %v593_v51, %v581_v39 }
 0x724   : >> { %v595_v53 = vsub.f32 %v999_v28, %v594_v52 }
 0x726   : >> { %v596_v54 = vsel %vm230_vm3, %v595_v53, -inf }
 0x727   : >> { %597 = vmax.xlane.f32.xlu0 %v596_v54 }
 0x7b0   : >> { %v598_v55 = vpop.xlane.xlu0 %597 }
 0x7b1   : >> { %v599_v56 = vsub.f32 %v595_v53, %v598_v55 }
 0x7b3   : >> { %v600_v58 = vmul.f32 1.442695, %v599_v56 }
 0x7b5   : >> { %925 = vpow2.f32 %v600_v58 }
 0x7c2   : >> { %v926_v59 = vpop.eup %925 }
 0x7c3   : >> { %v602_v33 = vsel %vm230_vm3, %v926_v59, 0.0 }
 0x7c4   : >> { %603 = vadd.xlane.f32.xlu0 %v602_v33 }
 0x84d   : >> { %v604_v60 = vpop.xlane.xlu0 %603 }
 0x84e   : >> { %927 = vlog2.f32 %v604_v60 }
 0x85b   : >> { %v928_v61 = vpop.eup %927 }
 0x85c   : >> { %v606_v62 = vmul.f32 0.6931472, %v928_v61 }
 0x85e   : >> { %v607_v63 = vadd.f32 %v606_v62, %v598_v55  ;;  %572 = sbr.rel (!%p570_p1) target bundleno = 1766 (0x6e6), region = 76 }
 0x860   : >> { %v608_v0 = vsub.f32 %v595_v53, %v607_v63  }
 0x862   : >> { %v998_v28 = vmov %v608_v0   ;;  %v609_v30 = vmul.f32 (%p570_p1), 1.442695, %v608_v0 }
 0x863   : > { %v711_v28 = vsub.f32 1.0, %v971_v17  ;;  %715 = vst.msk [vmem:[%s1251_s5] sm:$0x1] (%p62_p2), %vm146_vm2, %v1253_v1 }
 0x864   : > { %929 = vpow2.f32 %v609_v30 }
 0x871   : > { %v930_v2 = vpop.eup %929 }
 0x872   : > { %823 = vmatmul.mubr.msk.f32.vlgmr.msra.gmra.mxu1 %vm288_vm5, %v930_v2 }
 0x932   : > { %v680_v31 = vpop.f32.mrf.mxu1 }
 0x933   : > { %v684_v7 = vmul.f32 %v680_v31, %v1047_v3 }
 0x934   : > { %v824_v8 = vpop.f32.mrf.mxu1 }
 0x935   : > { %v685_v9 = vsel %vm366_vm6, %v684_v7, 0.0 }
 0x936   : > { %v686_v10 = vrot.slane %v685_v9, 4 }
 0x938   : > { %v687_v11 = vadd.f32 %v686_v10, %v685_v9 }
 0x93a   : > { %v688_v12 = vrot.slane %v687_v11, 2 }
 0x93c   : > { %v689_v13 = vadd.f32 %v688_v12, %v687_v11 }
 0x93e   : > { %v690_v14 = vrot.slane %v689_v13, 1 }
 0x940   : > { %v691_v15 = vadd.f32 %v690_v14, %v689_v13 }
 0x942   : > { %v692_v21 = vmul.f32 0.2, %v691_v15 }
 0x944   : > { %v694_v23 = vadd.f32 %v693_v16, %v692_v21 }
 0x946   : > { %v695_v25 = vand.u32 2147483647, %v694_v23 }
 0x948   : > { %v696_v26 = vsel %vm146_vm2, %v695_v25, 0.0 }
 0x949   : > { %697 = vadd.xlane.f32.xlu0 %v696_v26 }
 0x9d2   : > { %v698_v27 = vpop.xlane.xlu0 %697 }
 0x9d3   : > { %931 = vrcp.f32 %v698_v27 }
 0x9e0   : > { %v932_v29 = vpop.eup %931 }
 0x9e1   : > { %v700_v32 = vmul.f32 %v932_v29, %v694_v23 }
 0x9e3   : > { %v701_v35 = vsub.f32 %v700_v32, %v1164_v36  ;;  %v712_v37 = vmul.f32 %v711_v28, %v700_v32 }
 0x9e5   : > { %v702_v38 = vmul.f32 %v701_v35, %v701_v35  ;;  %v713_v57 = vadd.f32 %v712_v37, %v710_v34  }
 0x9e7   : > { %v703_v39 = vsel %vm146_vm2, %v702_v38, 0.0  ;;  %v1255_v19 = vmov %v713_v57  ;;  %770 = vst.msk [vmem:[%s1251_s5 + $0x1] sm:$0x1] (%p62_p2), %vm146_vm2, %v713_v57 }
 0x9e8   : > { %704 = vadd.xlane.f32.xlu0 %v703_v39 }
 0xa70   :  { %64 = sbr.rel (!%p62_p2) target bundleno = 133 (0x85), region = 87 }
 0xa71   : > { %v705_v40 = vpop.xlane.xlu0 %704 }
 0xa72   : > { %vm706_vm8 = vcmp.lt.f32.partialorder %v705_v40, 1e-10 }
 0xa73   : > { %v769_v41 = vsel %vm706_vm8, 1.0, %v1006_v22 }
 0xa74   : > { %v709_v17 = vmax.f32 %v971_v17, %v769_v41  }

</bundles_post_ra>
